<compile_context>
chip_gen: v7x
topology: tpu7x:2x2x1
jax: 0.10.0
libtpu: 0.0.40
codegen_flags: <defaults>
</compile_context>

<pallas_src>
import math
import functools

import jax
import jax.numpy as jnp
from jax.experimental import pallas as pl
from jax.experimental.pallas import tpu as pltpu


# ----------------------------------------------------------------------------- kernel ----
def pos_enc_kernel(x_ref, pe_ref, o_ref):
    # x_ref: [tile_b, tile_f]   pe_ref: [1, tile_f]   o_ref: [tile_b, tile_f]
    # Single lane-dense VPU add; the PE row broadcasts over the batch (sublane) axis.
    # TODO(synk): training-mode dropout (p=0.3 mask + 1/(1-p) scale) omitted -> identity,
    #             matching eval()/inference semantics of the PyTorch module.
    o_ref[...] = x_ref[...] + pe_ref[...]


# ----------------------------------------------------------------------------- wrapper ---
def make_position_enc(hidden_size, max_seq_length=2048):
    """Sinusoidal table, identical to the PyTorch buffer: [max_seq_length, hidden_size]."""
    position = jnp.arange(max_seq_length, dtype=jnp.float32)[:, None]          # [L, 1]
    div_term = jnp.exp(
        jnp.arange(0, hidden_size, 2, dtype=jnp.float32)
        * (-math.log(10000.0) / hidden_size))                                  # [H/2]
    angles = position * div_term                                               # [L, H/2]
    pe = jnp.zeros((max_seq_length, hidden_size), jnp.float32)
    pe = pe.at[:, 0::2].set(jnp.sin(angles))
    pe = pe.at[:, 1::2].set(jnp.cos(angles))
    return pe


def _pick_tile(n, quantum, target):
    """Largest multiple of `quantum` that divides n and is <= target; else full extent.

    Keeps blocks compliant with the (8, 128) tiling rule (multiple of quantum OR the
    full array extent) while bounding per-block VMEM.
    """
    if n <= target:
        return n
    if n % quantum:
        return n                      # ragged: fall back to full extent (still valid)
    t = (min(target, n) // quantum) * quantum
    while t >= quantum:
        if n % t == 0:
            return t
        t -= quantum
    return n


@functools.partial(jax.jit, static_argnames=("max_seq_length",))
def positional_encoding(inputs, position_enc=None, *, max_seq_length=2048):
    """inputs: [B, S, H] float32.  Returns inputs + PE[:S] (dropout = identity)."""
    B, S, H = inputs.shape
    if position_enc is None:
        position_enc = make_position_enc(H, max_seq_length)

    # Flatten (S, H) -> F so the last (lane) dimension of every block is dense.
    F = S * H
    x2 = inputs.reshape(B, F)                                     # metadata-only reshape
    pe2 = position_enc[:S].reshape(1, F).astype(inputs.dtype)

    # Lane axis first (multiples of 128), then batch sublanes under a joint per-block
    # budget of ~512K elems (2 MiB f32): double-buffered x + out blocks ~8 MiB VMEM,
    # safely inside the default scoped limit on every TPU generation.
    elem_budget = 512 * 1024
    tile_f = _pick_tile(F, 128, 8192)
    tile_b = _pick_tile(B, 8, max(8, elem_budget // max(tile_f, 1)))

    grid = (B // tile_b, F // tile_f)

    out2 = pl.pallas_call(
        pos_enc_kernel,
        out_shape=jax.ShapeDtypeStruct((B, F), inputs.dtype),
        grid_spec=pltpu.PrefetchScalarGridSpec(
            num_scalar_prefetch=0,
            grid=grid,
            in_specs=[
                pl.BlockSpec((tile_b, tile_f), lambda i, j: (i, j)),   # activations
                pl.BlockSpec((1, tile_f), lambda i, j: (0, j)),        # PE (batch-bcast)
            ],
            out_specs=pl.BlockSpec((tile_b, tile_f), lambda i, j: (i, j)),
        ),
        compiler_params=pltpu.CompilerParams(
            dimension_semantics=("parallel", "parallel")),             # megacore-friendly
    )(x2, pe2)

    return out2.reshape(B, S, H)


# ----------------------------------------------------------------------------- reference -
def reference_positional_encoding(inputs, position_enc):
    S = inputs.shape[1]
    return inputs + position_enc[None, :S, :]


# ----------------------------------------------------------------------------- main ------
if __name__ == "__main__":
    B, S, H = 2, 8, 32
    max_seq_length = 2048

    key = jax.random.PRNGKey(0)
    inputs = jax.random.normal(key, (B, S, H), jnp.float32)

    pe_table = make_position_enc(H, max_seq_length)

    out = positional_encoding(inputs, pe_table, max_seq_length=max_seq_length)
    out = jax.block_until_ready(out)

    ref = reference_positional_encoding(inputs, pe_table)
    assert out.shape == (B, S, H)
    assert jnp.allclose(out, ref, atol=1e-6, rtol=1e-6), "mismatch vs reference"

    print("KERNEL_OK")
</pallas_src>

<mosaic_0001>
module attributes {stable_mosaic.version = 11 : i64} {
  func.func @pos_enc_kernel(%arg0: i32, %arg1: i32, %arg2: memref<2x256xf32, #tpu.memory_space<vmem>>, %arg3: memref<1x256xf32, #tpu.memory_space<vmem>>, %arg4: memref<2x256xf32, #tpu.memory_space<vmem>>) attributes {dimension_semantics = [#tpu.dimension_semantics<parallel>, #tpu.dimension_semantics<parallel>], iteration_bounds = array<i64: 1, 1>, scalar_prefetch = 0 : i64, scratch_operands = 0 : i64, tpu.core_type = #tpu.core_type<tc>, window_params = [{transform_indices = @transform_0, window_bounds = array<i64: 2, 256>}, {transform_indices = @transform_1, window_bounds = array<i64: 1, 256>}, {transform_indices = @transform_2, window_bounds = array<i64: 2, 256>}]} {
    %c0 = arith.constant 0 : index
    %c0_0 = arith.constant 0 : index
    %0 = vector.load %arg2[%c0, %c0_0] : memref<2x256xf32, #tpu.memory_space<vmem>>, vector<2x256xf32>
    %c0_1 = arith.constant 0 : index
    %c0_2 = arith.constant 0 : index
    %1 = vector.load %arg3[%c0_1, %c0_2] : memref<1x256xf32, #tpu.memory_space<vmem>>, vector<1x256xf32>
    %2 = vector.broadcast %1 : vector<1x256xf32> to vector<2x256xf32>
    %3 = arith.addf %0, %2 : vector<2x256xf32>
    %c0_3 = arith.constant 0 : index
    %c0_4 = arith.constant 0 : index
    %4 = vector.load %arg4[%c0_3, %c0_4] : memref<2x256xf32, #tpu.memory_space<vmem>>, vector<2x256xf32>
    tpu.vector_store %arg4[%c0_3, %c0_4], %3 {strides = array<i32>} : memref<2x256xf32, #tpu.memory_space<vmem>>, vector<2x256xf32>,
    return
  }
  func.func @transform_0(%arg0: i32, %arg1: i32) -> (i32, i32) {
    %c0_i32 = arith.constant 0 : i32
    return %arg0, %arg1 : i32, i32
  }
  func.func @transform_1(%arg0: i32, %arg1: i32) -> (i32, i32) {
    %c0_i32 = arith.constant 0 : i32
    %c0_i32_0 = arith.constant 0 : i32
    return %c0_i32, %arg1 : i32, i32
  }
  func.func @transform_2(%arg0: i32, %arg1: i32) -> (i32, i32) {
    %c0_i32 = arith.constant 0 : i32
    return %arg0, %arg1 : i32, i32
  }
}

</mosaic_0001>

<bundles_post_ra>
// kernel: positional_encoding.1
= control target key start
LH: loop header
LB: loop body
LE: loop exit
PB: predicated region body
PF: predicated region fallthrough
CT: control target
= control target key end

     0   :  { %v14_v0 = vlaneseq  ;;  %v38_v1 = vmov 1983009808   ;;  %s63_s1 = inlined_call_operand.vmem [shape: f32[1,256], index: 1, kind: input, shape index: {}]   ;;  %s64_s0 = inlined_call_operand.vmem [shape: f32[2,256], index: 0, kind: input, shape index: {}]   ;;  %s65_s2 = inlined_call_operand.vmem [shape: f32[2,256], index: 2, kind: output, shape index: {}]  }
   0x1   :  { %v24_v2 = vunpack.c.l.s4 %v38_v1  ;;  %v12_v4 = vld [vmem:[%s63_s1] sm:$0x3] }
   0x2   :  { %v15_v3 = vshrl.u32 %v14_v0, 7  ;;  %v11_v12 = vld [vmem:[%s64_s0] sm:$0xf] }
   0x3   :  { %v25_v5 = vunpack.c.0.s8 %v24_v2 }
   0x4   :  { %v16_v6 = vsub.s32 0, %v15_v3  ;;  %v20_v7 = vsub.s32 1, %v15_v3 }
   0x5   :  { %v28_v10 = vsub.s32 %v25_v5, %v15_v3 }
   0x6   :  { %v17_v8 = vrot.slane %v12_v4, %v16_v6  ;;  %v21_v9 = vrot.slane %v12_v4, %v20_v7 }
   0x8   :  { %v22_v11 = vcombine.low %v17_v8, %v21_v9 }
   0xa   :  { %v29_v13 = vrot.slane %v22_v11, %v28_v10 }
   0xc   :  { %v31_v14 = vadd.f32 %v29_v13, %v11_v12 }
   0xe   :  { %32 = vst [vmem:[%s65_s2] sm:$0xf] %v31_v14 }

</bundles_post_ra>
